<compile_context>
chip_gen: v5e
topology: v5e:2x2
jax: 0.10.0
libtpu: 0.0.40
codegen_flags: <defaults>
</compile_context>

<pallas_src>
import jax
import jax.numpy as jnp
from jax.experimental import pallas as pl
from jax.experimental.pallas import tpu as pltpu

_NEG_PAD = -1e30  # finite "-inf": exp underflows to 0, no inf-inf / 0*inf NaNs


def _ce_kernel(x_ref, t_ref, w_ref, nll_ref, wt_ref):
    """One batch tile of weighted cross-entropy (per-row partials).

    x_ref:   [TILE_N, C_pad] logits (native dtype; upcast inside expressions)
    t_ref:   [TILE_N, 1]     int32 targets (padded rows hold -1)
    w_ref:   [1, C_pad]      f32 class weights (padded classes hold 0)
    nll_ref: [TILE_N, 1]     f32 per-row w[t] * (logsumexp(x) - x[t])
    wt_ref:  [TILE_N, 1]     f32 per-row w[t]
    """
    x = x_ref[...]                                   # native dtype, no f32 copy
    t = t_ref[...]                                   # [TILE_N, 1] int32
    w = w_ref[...]                                   # [1, C_pad]  f32

    # Row max in the native dtype (exact), f32 only inside the exp chain.
    m = jnp.max(x, axis=-1, keepdims=True)                              # [TILE_N, 1]
    mf = m.astype(jnp.float32)
    lse = mf + jnp.log(
        jnp.sum(jnp.exp(x.astype(jnp.float32) - mf), axis=-1, keepdims=True))

    # Target gather via a (1, C_pad) iota + bool mask (no f32 one-hot temps).
    class_ids = jax.lax.broadcasted_iota(jnp.int32, (1, x.shape[-1]), 1)  # [1, C_pad]
    mask = class_ids == t                                                  # [TILE_N, C_pad] bool
    # Single nonzero per row -> native-dtype sum is exact; cast the [TILE_N,1] result.
    tgt_logit = jnp.sum(jnp.where(mask, x, 0.0), axis=-1,
                        keepdims=True).astype(jnp.float32)                 # [TILE_N, 1]
    wt = jnp.sum(jnp.where(mask, w, 0.0), axis=-1, keepdims=True)          # [TILE_N, 1] f32

    nll_ref[...] = wt * (lse - tgt_logit)
    wt_ref[...] = wt


def _round_up(x, m):
    return ((x + m - 1) // m) * m


def _pick_tile_n(c_pad, itemsize):
    """Rows per tile from an intermediate-aware VMEM budget.

    Working set per element of the [TILE_N, C_pad] tile:
      2 * itemsize  (double-buffered input DMA)
      + ~12 B       (f32 exp temp, f32 masked-weight temp, bool mask, slack)
    Budget: ~3/8 of physical VMEM, capped at 48 MiB (so ~48 MiB on v5e/v6e's
    128 MiB, ~24 MiB on v7x's 64 MiB per-TC VMEM).
    """
    try:
        vmem = pltpu.get_tpu_info().vmem_capacity_bytes
    except Exception:
        vmem = 64 * 1024 * 1024  # v7x per-TC physical VMEM; safe lower bound
    budget = min((vmem * 3) // 8, 48 * 1024 * 1024)
    per_elem = 2 * itemsize + 12
    tile = budget // (c_pad * per_elem)
    tile = max(8, min(1024, (tile // 8) * 8))
    # Explicit scoped-VMEM limit: budget + headroom, well under physical VMEM.
    vmem_limit = min(budget + 8 * 1024 * 1024, (vmem * 7) // 8)
    return tile, vmem_limit


def sequence_criteria_loss(inputs, targets, class_weight, *, tile_n=None):
    """JAX wrapper for SequenceCriteria.forward (weighted-mean CE)."""
    n, c = inputs.shape
    assert c < 2**31, "int32 class-id arithmetic requires C < 2**31"

    # Lane-dense class axis: pad C to a multiple of 128.
    c_pad = _round_up(max(c, 1), 128)
    itemsize = jnp.dtype(inputs.dtype).itemsize
    auto_tile, vmem_limit = _pick_tile_n(c_pad, itemsize)
    if tile_n is None:
        tile_n = auto_tile
    tile_n = max(8, min(tile_n, _round_up(n, 8)))
    tile_n = _round_up(tile_n, 8)
    n_pad = _round_up(n, tile_n)
    grid_n = n_pad // tile_n

    # Pad logits with a large finite negative (keeps logsumexp exact & finite),
    # weights with 0, padded batch rows with target=-1 (never matches the mask,
    # so padded rows contribute exactly 0 to numerator and denominator).
    x = jnp.pad(inputs, ((0, n_pad - n), (0, c_pad - c)), constant_values=_NEG_PAD)
    t2d = jnp.pad(targets.astype(jnp.int32), (0, n_pad - n),
                  constant_values=-1).reshape(n_pad, 1)
    w2d = jnp.pad(class_weight.astype(jnp.float32), (0, c_pad - c)).reshape(1, c_pad)

    cost = pl.CostEstimate(
        flops=8 * n_pad * c_pad,
        transcendentals=n_pad * c_pad + n_pad,
        bytes_accessed=(n_pad * c_pad * itemsize      # logits read
                        + n_pad * 4 + c_pad * 4        # targets + weights read
                        + 2 * n_pad * 4),              # per-row partials written
    )

    nll, wts = pl.pallas_call(
        _ce_kernel,
        out_shape=(jax.ShapeDtypeStruct((n_pad, 1), jnp.float32),
                   jax.ShapeDtypeStruct((n_pad, 1), jnp.float32)),
        grid_spec=pltpu.PrefetchScalarGridSpec(
            num_scalar_prefetch=0,
            grid=(grid_n,),
            in_specs=[
                pl.BlockSpec((tile_n, c_pad), lambda i: (i, 0)),   # logits: streamed
                pl.BlockSpec((tile_n, 1), lambda i: (i, 0)),       # targets: streamed
                pl.BlockSpec((1, c_pad), lambda i: (0, 0)),        # weights: resident
            ],
            out_specs=[
                pl.BlockSpec((tile_n, 1), lambda i: (i, 0)),       # per-row nll
                pl.BlockSpec((tile_n, 1), lambda i: (i, 0)),       # per-row weight
            ],
        ),
        compiler_params=pltpu.CompilerParams(
            # Every grid step is independent -> shardable across v7x's two TCs.
            dimension_semantics=("parallel",),
            vmem_limit_bytes=int(vmem_limit),
        ),
        cost_estimate=cost,
    )(x, t2d, w2d)

    # Final reduction + divide in plain JAX (padded rows contribute 0 to both).
    return jnp.sum(nll) / jnp.sum(wts)


def _reference_loss(inputs, targets, class_weight):
    # Pure-JAX reference matching PyTorch CrossEntropyLoss(weight=w) semantics.
    x = inputs.astype(jnp.float32)
    logp = jax.nn.log_softmax(x, axis=-1)
    tgt_logp = jnp.take_along_axis(
        logp, targets[:, None].astype(jnp.int32), axis=-1)[:, 0]
    w = class_weight.astype(jnp.float32)[targets]
    return jnp.sum(-w * tgt_logp) / jnp.sum(w)


if __name__ == "__main__":
    key = jax.random.PRNGKey(0)

    # Case 1: small shapes implied by the forward: logits [N, C], targets [N],
    # class weight [C].
    N, C = 8, 32
    k_x, k_t, k_w, key = jax.random.split(key, 4)
    inputs = jax.random.normal(k_x, (N, C), dtype=jnp.float32)
    targets = jax.random.randint(k_t, (N,), 0, C, dtype=jnp.int32)
    class_weight = jax.random.uniform(k_w, (C,), dtype=jnp.float32,
                                      minval=0.5, maxval=1.5)

    loss = jax.block_until_ready(sequence_criteria_loss(inputs, targets, class_weight))
    ref = _reference_loss(inputs, targets, class_weight)
    assert jnp.allclose(loss, ref, rtol=1e-5, atol=1e-5), (loss, ref)

    # Case 2: uneven N/C + forced small tile to exercise batch/class padding
    # and the multi-step (grid > 1) per-tile partial path.
    N2, C2 = 20, 50
    k_x, k_t, k_w, key = jax.random.split(key, 4)
    inputs2 = jax.random.normal(k_x, (N2, C2), dtype=jnp.float32)
    targets2 = jax.random.randint(k_t, (N2,), 0, C2, dtype=jnp.int32)
    class_weight2 = jax.random.uniform(k_w, (C2,), dtype=jnp.float32,
                                       minval=0.5, maxval=1.5)

    loss2 = jax.block_until_ready(
        sequence_criteria_loss(inputs2, targets2, class_weight2, tile_n=8))
    ref2 = _reference_loss(inputs2, targets2, class_weight2)
    assert jnp.allclose(loss2, ref2, rtol=1e-5, atol=1e-5), (loss2, ref2)

    # Case 3: bf16 logits exercise the native-dtype streaming / in-expression
    # upcast path.
    N3, C3 = 64, 96
    k_x, k_t, k_w, key = jax.random.split(key, 4)
    inputs3 = jax.random.normal(k_x, (N3, C3), dtype=jnp.float32).astype(jnp.bfloat16)
    targets3 = jax.random.randint(k_t, (N3,), 0, C3, dtype=jnp.int32)
    class_weight3 = jax.random.uniform(k_w, (C3,), dtype=jnp.float32,
                                       minval=0.5, maxval=1.5)

    loss3 = jax.block_until_ready(
        sequence_criteria_loss(inputs3, targets3, class_weight3))
    ref3 = _reference_loss(inputs3.astype(jnp.float32), targets3, class_weight3)
    assert jnp.allclose(loss3, ref3, rtol=2e-2, atol=2e-2), (loss3, ref3)

    print("KERNEL_OK")
</pallas_src>

<mosaic_0001>
module attributes {stable_mosaic.version = 11 : i64} {
  func.func @_ce_kernel(%arg0: i32, %arg1: memref<8x128xf32, #tpu.memory_space<vmem>>, %arg2: memref<8x1xi32, #tpu.memory_space<vmem>>, %arg3: memref<1x128xf32, #tpu.memory_space<vmem>>, %arg4: memref<8x1xf32, #tpu.memory_space<vmem>>, %arg5: memref<8x1xf32, #tpu.memory_space<vmem>>) attributes {dimension_semantics = [#tpu.dimension_semantics<parallel>], iteration_bounds = array<i64: 1>, scalar_prefetch = 0 : i64, scratch_operands = 0 : i64, tpu.core_type = #tpu.core_type<tc>, window_params = [{transform_indices = @transform_0, window_bounds = array<i64: 8, 128>}, {transform_indices = @transform_1, window_bounds = array<i64: 8, 1>}, {pipeline_mode = #tpu.pipeline_mode<synchronous>, transform_indices = @transform_2, window_bounds = array<i64: 1, 128>}, {transform_indices = @transform_3, window_bounds = array<i64: 8, 1>}, {transform_indices = @transform_4, window_bounds = array<i64: 8, 1>}]} {
    %c0 = arith.constant 0 : index
    %c0_0 = arith.constant 0 : index
    %0 = vector.load %arg1[%c0, %c0_0] : memref<8x128xf32, #tpu.memory_space<vmem>>, vector<8x128xf32>
    %c0_1 = arith.constant 0 : index
    %c0_2 = arith.constant 0 : index
    %1 = vector.load %arg2[%c0_1, %c0_2] : memref<8x1xi32, #tpu.memory_space<vmem>>, vector<8x1xi32>
    %c0_3 = arith.constant 0 : index
    %c0_4 = arith.constant 0 : index
    %2 = vector.load %arg3[%c0_3, %c0_4] : memref<1x128xf32, #tpu.memory_space<vmem>>, vector<1x128xf32>
    %cst = arith.constant dense<0xFF800000> : vector<8xf32>
    %3 = vector.multi_reduction <maximumf>, %0, %cst [1] : vector<8x128xf32> to vector<8xf32>
    %4 = vector.shape_cast %3 : vector<8xf32> to vector<8x1xf32>
    %5 = vector.broadcast %4 : vector<8x1xf32> to vector<8x128xf32>
    %6 = arith.subf %0, %5 : vector<8x128xf32>
    %7 = math.exp %6 : vector<8x128xf32>
    %cst_5 = arith.constant dense<0.000000e+00> : vector<8xf32>
    %8 = vector.multi_reduction <add>, %7, %cst_5 [1] : vector<8x128xf32> to vector<8xf32>
    %9 = vector.shape_cast %8 : vector<8xf32> to vector<8x1xf32>
    %10 = math.log %9 : vector<8x1xf32>
    %11 = arith.addf %4, %10 : vector<8x1xf32>
    %12 = tpu.iota {dimensions = array<i32: 1>} : vector<1x128xi32>
    %13 = vector.broadcast %12 : vector<1x128xi32> to vector<8x128xi32>
    %14 = vector.broadcast %1 : vector<8x1xi32> to vector<8x128xi32>
    %15 = arith.cmpi eq, %13, %14 : vector<8x128xi32>
    %cst_6 = arith.constant 0.000000e+00 : f32
    %16 = vector.broadcast %cst_6 : f32 to vector<8x128xf32>
    %17 = arith.select %15, %0, %16 : vector<8x128xi1>, vector<8x128xf32>
    %cst_7 = arith.constant dense<0.000000e+00> : vector<8xf32>
    %18 = vector.multi_reduction <add>, %17, %cst_7 [1] : vector<8x128xf32> to vector<8xf32>
    %19 = vector.shape_cast %18 : vector<8xf32> to vector<8x1xf32>
    %cst_8 = arith.constant 0.000000e+00 : f32
    %20 = vector.shape_cast %2 : vector<1x128xf32> to vector<1x128xf32>
    %21 = vector.broadcast %20 : vector<1x128xf32> to vector<8x128xf32>
    %22 = vector.broadcast %cst_8 : f32 to vector<8x128xf32>
    %23 = arith.select %15, %21, %22 : vector<8x128xi1>, vector<8x128xf32>
    %cst_9 = arith.constant dense<0.000000e+00> : vector<8xf32>
    %24 = vector.multi_reduction <add>, %23, %cst_9 [1] : vector<8x128xf32> to vector<8xf32>
    %25 = vector.shape_cast %24 : vector<8xf32> to vector<8x1xf32>
    %26 = arith.subf %11, %19 : vector<8x1xf32>
    %27 = arith.mulf %25, %26 : vector<8x1xf32>
    %c0_10 = arith.constant 0 : index
    %c0_11 = arith.constant 0 : index
    %28 = vector.load %arg4[%c0_10, %c0_11] : memref<8x1xf32, #tpu.memory_space<vmem>>, vector<8x1xf32>
    tpu.vector_store %arg4[%c0_10, %c0_11], %27 {strides = array<i32>} : memref<8x1xf32, #tpu.memory_space<vmem>>, vector<8x1xf32>,
    %c0_12 = arith.constant 0 : index
    %c0_13 = arith.constant 0 : index
    %29 = vector.load %arg5[%c0_12, %c0_13] : memref<8x1xf32, #tpu.memory_space<vmem>>, vector<8x1xf32>
    tpu.vector_store %arg5[%c0_12, %c0_13], %25 {strides = array<i32>} : memref<8x1xf32, #tpu.memory_space<vmem>>, vector<8x1xf32>,
    return
  }
  func.func @transform_0(%arg0: i32) -> (i32, i32) {
    %c0_i32 = arith.constant 0 : i32
    %c0_i32_0 = arith.constant 0 : i32
    return %arg0, %c0_i32 : i32, i32
  }
  func.func @transform_1(%arg0: i32) -> (i32, i32) {
    %c0_i32 = arith.constant 0 : i32
    %c0_i32_0 = arith.constant 0 : i32
    return %arg0, %c0_i32 : i32, i32
  }
  func.func @transform_2(%arg0: i32) -> (i32, i32) {
    %c0_i32 = arith.constant 0 : i32
    %c0_i32_0 = arith.constant 0 : i32
    %c0_i32_1 = arith.constant 0 : i32
    return %c0_i32, %c0_i32_0 : i32, i32
  }
  func.func @transform_3(%arg0: i32) -> (i32, i32) {
    %c0_i32 = arith.constant 0 : i32
    %c0_i32_0 = arith.constant 0 : i32
    return %arg0, %c0_i32 : i32, i32
  }
  func.func @transform_4(%arg0: i32) -> (i32, i32) {
    %c0_i32 = arith.constant 0 : i32
    %c0_i32_0 = arith.constant 0 : i32
    return %arg0, %c0_i32 : i32, i32
  }
}

</mosaic_0001>

<bundles_post_ra>
// kernel: tpu_custom_call.1
= control target key start
LH: loop header
LB: loop body
LE: loop exit
PB: predicated region body
PF: predicated region fallthrough
CT: control target
= control target key end

     0   :  { %v64_v1 = vmov 0   ;;  %v29_v7 = vlaneseq  ;;  %vm46_vm1 = vcmask 7168   ;;  %s105_s0 = inlined_call_operand.vmem [shape: f32[8,128], index: 0, kind: input, shape index: {}]   ;;  %s106_s2 = inlined_call_operand.vmem [shape: f32[1,128], index: 2, kind: input, shape index: {}]   ;;  %s107_s1 = inlined_call_operand.vmem [shape: s32[8,1], index: 1, kind: input, shape index: {}]   ;;  %s108_s4 = inlined_call_operand.vmem [shape: f32[8,1], index: 4, kind: output, shape index: {1}]   ;;  %s109_s3 = inlined_call_operand.vmem [shape: f32[8,1], index: 3, kind: output, shape index: {0}]  }
   0x1   :  { %v16_v0 = vld [vmem:[%s105_s0] sm:$0xff]  ;;  %58 = vset.pattern.permute.xlu0 %v64_v1 }
   0x2   :  { %19 = vmax.xlane.f32.xlu0 %v16_v0  ;;  %v17_v2 = vld [vmem:[%s107_s1] sm:$0xff]  ;;  %v30_v8 = vand.u32 127, %v29_v7 }
   0x3   :  { %v59_v9 = vld [vmem:[%s106_s2] ss:$0 sm:$0xff] }
  0x16   :  { %32 = vperm.xlu0 %58, %v17_v2  }
  0x75   :  { %v20_v3 = vpop.xlane.xlu0 %19 }
  0x76   :  { %v21_v4 = vsub.f32 %v16_v0, %v20_v3 }
  0x78   :  { %v22_v5 = vmul.f32 1.442695, %v21_v4 }
  0x7a   :  { %60 = vpow2.f32 %v22_v5 }
  0x80   :  { %v61_v6 = vpop.eup %60 }
  0x81   :  { %24 = vadd.xlane.f32.xlu1 %v61_v6 }
  0x88   :  { %v33_v10 = vpop.permute.xlu0 %32 }
  0x89   :  { %vm34_vm0 = vcmp.eq.s32.totalorder %v30_v8, %v33_v10 }
  0x8a   :  { %v41_v11 = vsel %vm34_vm0, %v59_v9, 0.0  ;;  %v35_v12 = vsel %vm34_vm0, %v16_v0, 0.0 }
  0x8b   :  { %42 = vadd.xlane.f32.xlu2 %v41_v11  ;;  %36 = vadd.xlane.f32.xlu1 %v35_v12 }
  0xf4   :  { %v25_v13 = vpop.xlane.xlu1 %24 }
  0xf5   :  { %62 = vlog2.f32 %v25_v13 }
  0xfb   :  { %v63_v14 = vpop.eup %62 }
  0xfc   :  { %v27_v15 = vmul.f32 0.6931472, %v63_v14 }
  0xfe   :  { %v43_v16 = vpop.xlane.xlu2 %42  ;;  %v28_v17 = vadd.f32 %v27_v15, %v20_v3  ;;  %v37_v18 = vpop.xlane.xlu1 %36 }
  0xff   :  { %48 = vst.msk [vmem:[%s108_s4] sm:$0xff] %vm46_vm1, %v43_v16 }
 0x100   :  { %v44_v19 = vsub.f32 %v28_v17, %v37_v18 }
 0x102   :  { %v45_v20 = vmul.f32 %v44_v19, %v43_v16 }
 0x104   :  { %47 = vst.msk [vmem:[%s109_s3] sm:$0xff] %vm46_vm1, %v45_v20 }

</bundles_post_ra>
